<compile_context>
chip_gen: v7x
topology: tpu7x:2x2x1
jax: 0.10.0
libtpu: 0.0.40
codegen_flags: <defaults>
</compile_context>

<pallas_src>
import functools

import numpy as np
import jax
import jax.numpy as jnp
from jax.experimental import pallas as pl
from jax.experimental.pallas import tpu as pltpu

_LANES = 128                 # lane width of a vreg
_TARGET_ROWS = 2048          # target sublane rows per grid step (multi-MiB DMAs)
_VMEM_BUDGET = 20 << 20      # double-buffered (in + out) footprint budget, bytes


def _choose_tiles(n, s, sig, out_bytes):
    """Pick (bn images/step, ts sublane-rows/step).

    Targets multi-MiB HBM traffic per grid step while keeping the
    double-buffered in+out footprint under _VMEM_BUDGET (safe on
    v5e/v6e/v7x scoped VMEM)."""
    # double-buffered bytes per sublane row of pixels (input + sig out channels)
    row_bytes = 2 * (_LANES * 4 + sig * _LANES * out_bytes)
    target = max(8, min(_TARGET_ROWS, _VMEM_BUDGET // row_bytes))
    if s >= target:
        # Tile the per-image pixel rows (multiple of 8 for layout legality);
        # a ragged last block is masked by Pallas.
        return 1, max(8, (target // 8) * 8)
    # Small images: whole-image slab (full-extent dim -> layout-legal), span
    # several images per step so per-step bytes still reach the target.
    bn = max(1, target // s)
    if n > 1:
        bn = min(bn, -(-n // 2))   # keep >= 2 grid steps so both v7x TCs get work
    return min(bn, n), s


def _afilter_kernel(x_ref, w_ref, b_ref, o_ref, *, tanh_dtype):
    # x_ref: (bn, 1, tr, 128)   VMEM  -- lane/sublane-dense slab of pixels
    # w_ref: (sig,)             SMEM  -- 1x1-conv weights (one scalar / channel)
    # b_ref: (sig,)             SMEM  -- conv bias
    # o_ref: (bn, sig, tr, 128) VMEM  -- same slab for every output channel
    #
    # Conv2d(1, sig, 1) with one input channel == per-pixel scale+bias;
    # Dropout2d is identity in eval mode; tanh runs on the VPU/EUP.
    # TODO(synk): Dropout2d(p=0.5) training-mode channel masking not implemented
    # (inference semantics: identity).
    x = x_ref[:, 0, :, :]                      # (bn, tr, 128) f32
    for c in range(o_ref.shape[1]):            # static unroll over channels
        y = (w_ref[c] * x + b_ref[c]).astype(tanh_dtype)   # scalar-operand VPU ops
        o_ref[:, c, :, :] = jnp.tanh(y).astype(o_ref.dtype)


def afilter_forward(x, weight, bias, *, out_dtype=jnp.float32):
    """x: (N, 1, H, W) float32 (NCHW, matching the PyTorch module).
    weight: (sig, 1, 1, 1), bias: (sig,) -- Conv2d(1, sig, 1) parameters.
    Returns (N, sig, H, W) of `out_dtype` (float32 matches the module;
    bfloat16 roughly halves HBM write traffic if downstream allows it)."""
    n, c, h, w_sp = x.shape
    assert c == 1, "afilter expects a single input channel"
    sig = weight.shape[0]

    hw = h * w_sp
    s = pl.cdiv(hw, _LANES)            # sublane rows of pixels per image
    hw_pad = s * _LANES

    x_rows = x.reshape(n, 1, hw)
    if hw_pad != hw:
        # TODO(synk): non-128-aligned H*W takes a one-time pad + slice (extra
        # HBM passes); an in-kernel ragged final lane-row would avoid it.
        x_rows = jnp.pad(x_rows, ((0, 0), (0, 0), (0, hw_pad - hw)))
    x_tiles = x_rows.reshape(n, 1, s, _LANES)   # free contiguous view

    out_np_dtype = np.dtype(out_dtype)
    out_bytes = out_np_dtype.itemsize
    is_bf16 = out_np_dtype == np.dtype(jnp.bfloat16)
    tanh_dtype = jnp.bfloat16 if is_bf16 else jnp.float32

    w1 = weight.reshape(sig).astype(jnp.float32)   # SMEM scalars
    b1 = bias.reshape(sig).astype(jnp.float32)

    bn, ts = _choose_tiles(n, s, sig, out_bytes)
    grid = (pl.cdiv(n, bn), pl.cdiv(s, ts))

    out = pl.pallas_call(
        functools.partial(_afilter_kernel, tanh_dtype=tanh_dtype),
        out_shape=jax.ShapeDtypeStruct((n, sig, s, _LANES), out_dtype),
        grid_spec=pltpu.PrefetchScalarGridSpec(
            num_scalar_prefetch=0,
            grid=grid,
            in_specs=[
                pl.BlockSpec((bn, 1, ts, _LANES), lambda i, t: (i, 0, t, 0)),
                pl.BlockSpec(memory_space=pltpu.MemorySpace.SMEM),  # weights (resident)
                pl.BlockSpec(memory_space=pltpu.MemorySpace.SMEM),  # bias (resident)
            ],
            out_specs=pl.BlockSpec((bn, sig, ts, _LANES),
                                   lambda i, t: (i, 0, t, 0)),
        ),
        compiler_params=pltpu.CompilerParams(
            dimension_semantics=("parallel", "parallel"),
            vmem_limit_bytes=32 * 1024 * 1024),
        cost_estimate=pl.CostEstimate(
            flops=2 * n * sig * hw,
            transcendentals=n * sig * hw,
            bytes_accessed=n * hw * 4 + n * sig * hw * out_bytes + 8 * sig),
    )(x_tiles, w1, b1)

    if hw_pad != hw:
        out = out.reshape(n, sig, hw_pad)[:, :, :hw]
    # (N, sig, S, 128) -> (N, sig, H, W): contiguous minor-dim reshape (free).
    return out.reshape(n, sig, h, w_sp)


if __name__ == "__main__":
    key = jax.random.PRNGKey(0)
    k_x, k_w, k_b = jax.random.split(key, 3)

    sig = 4
    n, h, w_sp = 2, 16, 16   # H*W = 256 -> lane-aligned, no pad/slice path
    x = jax.random.normal(k_x, (n, 1, h, w_sp), dtype=jnp.float32)

    # Deterministic Conv2d(1, sig, 1) parameters (PyTorch-style uniform init;
    # fan_in = 1*1*1 so bound = 1.0).
    bound = 1.0
    weight = jax.random.uniform(k_w, (sig, 1, 1, 1), minval=-bound, maxval=bound,
                                dtype=jnp.float32)
    bias = jax.random.uniform(k_b, (sig,), minval=-bound, maxval=bound,
                              dtype=jnp.float32)

    # Pure-JAX reference: tanh(1x1 conv); Dropout2d is identity in eval mode.
    ref = jnp.tanh(x * weight.reshape(1, sig, 1, 1) + bias.reshape(1, sig, 1, 1))

    # Default float32 path (matches the PyTorch module).
    out = jax.block_until_ready(afilter_forward(x, weight, bias))
    assert out.shape == (n, sig, h, w_sp)
    assert out.dtype == jnp.float32
    assert jnp.allclose(out, ref, atol=1e-6, rtol=1e-6)

    # Optional bf16-output path (halves dominant HBM write traffic).
    out_bf16 = jax.block_until_ready(
        afilter_forward(x, weight, bias, out_dtype=jnp.bfloat16))
    assert out_bf16.shape == (n, sig, h, w_sp)
    assert out_bf16.dtype == jnp.bfloat16
    assert jnp.allclose(out_bf16.astype(jnp.float32), ref, atol=2e-2, rtol=2e-2)

    print("KERNEL_OK")
</pallas_src>

<mosaic_0001>
module attributes {stable_mosaic.version = 11 : i64} {
  func.func @_afilter_kernel(%arg0: i32, %arg1: i32, %arg2: memref<1x1x2x128xf32, #tpu.memory_space<vmem>>, %arg3: memref<4xf32, #tpu.memory_space<smem>>, %arg4: memref<4xf32, #tpu.memory_space<smem>>, %arg5: memref<1x4x2x128xf32, #tpu.memory_space<vmem>>) attributes {dimension_semantics = [#tpu.dimension_semantics<parallel>, #tpu.dimension_semantics<parallel>], iteration_bounds = array<i64: 2, 1>, scalar_prefetch = 0 : i64, scratch_operands = 0 : i64, tpu.core_type = #tpu.core_type<tc>, window_params = [{transform_indices = @transform_0, window_bounds = array<i64: 1, 1, 2, 128>}, {transform_indices = @transform_1, window_bounds = array<i64: 4>}, {transform_indices = @transform_2, window_bounds = array<i64: 4>}, {transform_indices = @transform_3, window_bounds = array<i64: 1, 4, 2, 128>}]} {
    %c0 = arith.constant 0 : index
    %c0_0 = arith.constant 0 : index
    %c0_1 = arith.constant 0 : index
    %c0_2 = arith.constant 0 : index
    %0 = vector.load %arg2[%c0, %c0_0, %c0_1, %c0_2] : memref<1x1x2x128xf32, #tpu.memory_space<vmem>>, vector<1x1x2x128xf32>
    %1 = vector.shape_cast %0 : vector<1x1x2x128xf32> to vector<1x2x128xf32>
    %c0_3 = arith.constant 0 : index
    %2 = memref.load %arg3[%c0_3] : memref<4xf32, #tpu.memory_space<smem>>
    %3 = vector.broadcast %2 : f32 to vector<1x2x128xf32>
    %4 = arith.mulf %3, %1 : vector<1x2x128xf32>
    %c0_4 = arith.constant 0 : index
    %5 = memref.load %arg4[%c0_4] : memref<4xf32, #tpu.memory_space<smem>>
    %6 = vector.broadcast %5 : f32 to vector<1x2x128xf32>
    %7 = arith.addf %4, %6 : vector<1x2x128xf32>
    %8 = math.tanh %7 : vector<1x2x128xf32>
    %c0_5 = arith.constant 0 : index
    %c0_6 = arith.constant 0 : index
    %c0_7 = arith.constant 0 : index
    %c0_8 = arith.constant 0 : index
    %9 = vector.load %arg5[%c0_5, %c0_6, %c0_7, %c0_8] : memref<1x4x2x128xf32, #tpu.memory_space<vmem>>, vector<1x1x2x128xf32>
    %10 = vector.shape_cast %9 : vector<1x1x2x128xf32> to vector<1x2x128xf32>
    %11 = vector.shape_cast %8 : vector<1x2x128xf32> to vector<1x1x2x128xf32>
    tpu.vector_store %arg5[%c0_5, %c0_6, %c0_7, %c0_8], %11 {strides = array<i32>} : memref<1x4x2x128xf32, #tpu.memory_space<vmem>>, vector<1x1x2x128xf32>,
    %c1 = arith.constant 1 : index
    %12 = memref.load %arg3[%c1] : memref<4xf32, #tpu.memory_space<smem>>
    %13 = vector.broadcast %12 : f32 to vector<1x2x128xf32>
    %14 = arith.mulf %13, %1 : vector<1x2x128xf32>
    %c1_9 = arith.constant 1 : index
    %15 = memref.load %arg4[%c1_9] : memref<4xf32, #tpu.memory_space<smem>>
    %16 = vector.broadcast %15 : f32 to vector<1x2x128xf32>
    %17 = arith.addf %14, %16 : vector<1x2x128xf32>
    %18 = math.tanh %17 : vector<1x2x128xf32>
    %c0_10 = arith.constant 0 : index
    %c1_11 = arith.constant 1 : index
    %c0_12 = arith.constant 0 : index
    %c0_13 = arith.constant 0 : index
    %19 = vector.load %arg5[%c0_10, %c1_11, %c0_12, %c0_13] : memref<1x4x2x128xf32, #tpu.memory_space<vmem>>, vector<1x1x2x128xf32>
    %20 = vector.shape_cast %19 : vector<1x1x2x128xf32> to vector<1x2x128xf32>
    %21 = vector.shape_cast %18 : vector<1x2x128xf32> to vector<1x1x2x128xf32>
    tpu.vector_store %arg5[%c0_10, %c1_11, %c0_12, %c0_13], %21 {strides = array<i32>} : memref<1x4x2x128xf32, #tpu.memory_space<vmem>>, vector<1x1x2x128xf32>,
    %c2 = arith.constant 2 : index
    %22 = memref.load %arg3[%c2] : memref<4xf32, #tpu.memory_space<smem>>
    %23 = vector.broadcast %22 : f32 to vector<1x2x128xf32>
    %24 = arith.mulf %23, %1 : vector<1x2x128xf32>
    %c2_14 = arith.constant 2 : index
    %25 = memref.load %arg4[%c2_14] : memref<4xf32, #tpu.memory_space<smem>>
    %26 = vector.broadcast %25 : f32 to vector<1x2x128xf32>
    %27 = arith.addf %24, %26 : vector<1x2x128xf32>
    %28 = math.tanh %27 : vector<1x2x128xf32>
    %c0_15 = arith.constant 0 : index
    %c2_16 = arith.constant 2 : index
    %c0_17 = arith.constant 0 : index
    %c0_18 = arith.constant 0 : index
    %29 = vector.load %arg5[%c0_15, %c2_16, %c0_17, %c0_18] : memref<1x4x2x128xf32, #tpu.memory_space<vmem>>, vector<1x1x2x128xf32>
    %30 = vector.shape_cast %29 : vector<1x1x2x128xf32> to vector<1x2x128xf32>
    %31 = vector.shape_cast %28 : vector<1x2x128xf32> to vector<1x1x2x128xf32>
    tpu.vector_store %arg5[%c0_15, %c2_16, %c0_17, %c0_18], %31 {strides = array<i32>} : memref<1x4x2x128xf32, #tpu.memory_space<vmem>>, vector<1x1x2x128xf32>,
    %c3 = arith.constant 3 : index
    %32 = memref.load %arg3[%c3] : memref<4xf32, #tpu.memory_space<smem>>
    %33 = vector.broadcast %32 : f32 to vector<1x2x128xf32>
    %34 = arith.mulf %33, %1 : vector<1x2x128xf32>
    %c3_19 = arith.constant 3 : index
    %35 = memref.load %arg4[%c3_19] : memref<4xf32, #tpu.memory_space<smem>>
    %36 = vector.broadcast %35 : f32 to vector<1x2x128xf32>
    %37 = arith.addf %34, %36 : vector<1x2x128xf32>
    %38 = math.tanh %37 : vector<1x2x128xf32>
    %c0_20 = arith.constant 0 : index
    %c3_21 = arith.constant 3 : index
    %c0_22 = arith.constant 0 : index
    %c0_23 = arith.constant 0 : index
    %39 = vector.load %arg5[%c0_20, %c3_21, %c0_22, %c0_23] : memref<1x4x2x128xf32, #tpu.memory_space<vmem>>, vector<1x1x2x128xf32>
    %40 = vector.shape_cast %39 : vector<1x1x2x128xf32> to vector<1x2x128xf32>
    %41 = vector.shape_cast %38 : vector<1x2x128xf32> to vector<1x1x2x128xf32>
    tpu.vector_store %arg5[%c0_20, %c3_21, %c0_22, %c0_23], %41 {strides = array<i32>} : memref<1x4x2x128xf32, #tpu.memory_space<vmem>>, vector<1x1x2x128xf32>,
    return
  }
  func.func @transform_0(%arg0: i32, %arg1: i32) -> (i32, i32, i32, i32) {
    %c0_i32 = arith.constant 0 : i32
    %c0_i32_0 = arith.constant 0 : i32
    %c0_i32_1 = arith.constant 0 : i32
    return %arg0, %c0_i32, %arg1, %c0_i32_0 : i32, i32, i32, i32
  }
  func.func @transform_1(%arg0: i32, %arg1: i32) -> i32 {
    %c0_i32 = arith.constant 0 : i32
    %c0_i32_0 = arith.constant 0 : i32
    return %c0_i32 : i32
  }
  func.func @transform_2(%arg0: i32, %arg1: i32) -> i32 {
    %c0_i32 = arith.constant 0 : i32
    %c0_i32_0 = arith.constant 0 : i32
    return %c0_i32 : i32
  }
  func.func @transform_3(%arg0: i32, %arg1: i32) -> (i32, i32, i32, i32) {
    %c0_i32 = arith.constant 0 : i32
    %c0_i32_0 = arith.constant 0 : i32
    %c0_i32_1 = arith.constant 0 : i32
    return %arg0, %c0_i32, %arg1, %c0_i32_0 : i32, i32, i32, i32
  }
}

</mosaic_0001>

<bundles_post_ra>
// kernel: tpu_custom_call.1
= control target key start
LH: loop header
LB: loop body
LE: loop exit
PB: predicated region body
PF: predicated region fallthrough
CT: control target
= control target key end

     0   :  { %8 = vsyncpa [#allocation3], 0  ;;  %s899_s0 = inlined_call_operand.hbm [shape: f32[2,1,2,128], index: 0, kind: input, shape index: {}]   ;;  %s900_s1 = inlined_call_operand.vmem [shape: f32[4], index: 1, kind: input, shape index: {}]   ;;  %s901_s2 = inlined_call_operand.vmem [shape: f32[4], index: 2, kind: input, shape index: {}]   ;;  %s902_s3 = inlined_call_operand.hbm [shape: f32[2,4,2,128], index: 3, kind: output, shape index: {}]  }
   0x1   :  { %10 = vsyncpa [#allocation3 + $0x1], 0 }
   0x2   :  { %11 = vsyncpa [#allocation5], 0 }
   0x3   :  { %12 = vsyncpa [#allocation8], 0 }
   0x4   :  { %13 = vsyncpa [#allocation4], 0 }
   0x5   :  { %15 = vsyncpa [#allocation4 + $0x1], 0  ;;  %s686_s12 = smov 0   ;;  %s688_s13 = smov 0  }
   0x6   :  { %s690_s14 = smov 0   ;;  %s692_s15 = smov 0  }
   0x7   :  { %s694_s16 = smov 0   ;;  %s696_s17 = smov 0  }
   0x8 LB: > { %s387_s18 = sadd.s32 4294967295, %s658_s17   ;;  %s388_s19 = sadd.s32 4294967294, %s658_s17   ;;  %s658_s17 = sphi %s696_s17, %s21_s17   ;;  %s654_s16 = sphi %s694_s16, %s925_s16   ;;  %s650_s15 = sphi %s692_s15, %s924_s15   ;;  %s646_s14 = sphi %s690_s14, %s923_s14   ;;  %s642_s13 = sphi %s688_s13, %s922_s13   ;;  %s638_s12 = sphi %s686_s12, %s921_s12  }
   0x9   : > { %p55_p0 = scmp.ne.s32.totalorder %s642_s13, %s638_s12  ;;  %p720_p1 = scmp.eq.s32.totalorder %s387_s18, 0 }
   0xa   : > { %p724_p2 = scmp.eq.s32.totalorder %s387_s18, 1  ;;  %p129_p3 = scmp.eq.s32.totalorder %s388_s19, 1 }
   0xb   : > { %s907_s20 = scalar_select %p720_p1, 1, 0 }
   0xc   : > { %s908_s21 = scalar_select %p724_p2, 1, 0 }
   0xd   : > { %p730_p4 = por %p720_p1, %p55_p0  ;;  %p389_p5 = scmp.ge.s32.totalorder %s658_s17, 1 }
   0xe   : > { %p735_p6 = por %p129_p3, %p55_p0  ;;  %p136_p7 = scmp.lt.s32.totalorder %s658_s17, 3 }
   0xf   : > { %s909_s22 = scalar_select %p730_p4, 1, 0 }
  0x10   : > { %s910_s23 = scalar_select %p735_p6, 1, 0 }
  0x11   : > { %s149_s26 = sshll.u32 %s900_s1, 4  ;;  %p743_p8 = pnand %p389_p5, %p136_p7  ;;  %s150_s26 = int_to_ptr.vmem [resolvable:$true] %s149_s26 }
  0x12   : > { %s160_s30 = sshll.u32 %s901_s2, 4  ;;  %s508_s5 = scalar_lea.vmem %s150_s26, 16  ;;  %s161_s30 = int_to_ptr.vmem [resolvable:$true] %s160_s30 }
  0x13   : > { %s911_s27 = scalar_select %p743_p8, 1, 0 }
  0x14   : > { %p427_p10 = pneg %p743_p8  ;;  %p509_p12 = scmp.ne.s32.totalorder %s150_s26, %s508_s5 }
  0x15   : > { %p516_p5 = scmp.lt.s32.totalorder %s150_s26, %s150_s26  ;;  %p517_p7 = scmp.lt.s32.totalorder %s508_s5, %s508_s5 }
  0x16   : > { %p755_p11 = pnand %p427_p10, %p720_p1 }
  0x17   : > { %p518_p9 = por %p517_p7, %p516_p5 }
  0x18   : > { %p510_p13 = pneg %p755_p11 }
  0x1a   : > { %p511_p0 = pnand %p510_p13, %p509_p12 }
  0x1c   : > { %p512_p3 = pneg %p511_p0 }
  0x1e   : > { %p519_p6 = pnand %p518_p9, %p512_p3 }
  0x20   : > { %522 = shalt.err (!%p519_p6)
}
  0x21   : > { %s660_s6 = smov [#allocation6]   ;;  %s523_s7 = scalar_lea.vmem %s161_s30, 16 }
  0x22   : > { %430 = dma.vmem_to_smem (!%p755_p11), %s150_s26, 16, %s660_s6, [#allocation5]  }
  0x23   : > { %p524_p10 = scmp.ne.s32.totalorder %s161_s30, %s523_s7  ;;  %p531_p8 = scmp.lt.s32.totalorder %s161_s30, %s161_s30 }
  0x24   : > { %p532_p2 = scmp.lt.s32.totalorder %s523_s7, %s523_s7 }
  0x25   : > { %p526_p1 = pnand %p524_p10, %p510_p13 }
  0x26   : > { %p533_p12 = por %p532_p2, %p531_p8 }
  0x27   : > { %p527_p4 = pneg %p526_p1 }
  0x29   : > { %p534_p0 = pnand %p533_p12, %p527_p4 }
  0x2b   : > { %537 = shalt.err (!%p534_p0)
}
  0x2c   : > { %s661_s8 = smov [#allocation7]   ;;  %s33_s9 = sadd.s32 1, %s654_s16 }
  0x2d   : > { %433 = dma.vmem_to_smem (!%p755_p11), %s161_s30, 16, %s661_s8, [#allocation8]  }
  0x2e   : > { %s42_s10 = sadd.s32 1, %s646_s14  ;;  %p35_p1 = scmp.ge.s32.totalorder %s33_s9, 2 }
  0x2f   : > { %p49_p2 = scmp.ne.s32.totalorder %s646_s14, %s642_s13  ;;  %p50_p4 = scmp.eq.s32.totalorder %s658_s17, 0 }
  0x30   : > { %p444_p6 = scmp.lt.s32.totalorder %s658_s17, 2  ;;  %s927_s9 = smov (%p35_p1, %s33_s9), 0 }
  0x31   : > { %p51_p8 = por %p50_p4, %p49_p2  ;;  %p913_p9 = scmp.ne.s32.totalorder %s908_s21, 0 }
  0x32   : > { %s37_s18 = ssub.s32 %s654_s16, %s927_s9  ;;  %s171_s19 = sand.u32 1, %s646_s14  }
  0x33   : > { %p775_p13 = por %p913_p9, %p49_p2  ;;  %p40_p3 = scmp.eq.s32.totalorder %s37_s18, 0 }
  0x34   : > { %s393_s24 = sshll.u32 %s171_s19, 1  ;;  %s394_s25 = sshll.u32 %s654_s16, 5 }
  0x35   : > { %s784_s26 = scalar_select %p40_p3, %s646_s14, %s42_s10  }
  0x36   : > { %s789_s30 = scalar_lea.hbm %s899_s0, %s394_s25  ;;  %s175_s21 = scalar_lea.vmem [#allocation2], %s393_s24 }
  0x37   : > { %s183_s4 = sshll.u32 %s175_s21, 4  ;;  %p793_p11 = pnand %p444_p6, %p51_p8  ;;  %s797_s4 = int_to_ptr.vmem [resolvable:$true] %s183_s4 }
  0x38   : > { %s172_s6 = scalar_lea.sflag [#allocation3], %s171_s19  ;;  %s538_s7 = scalar_lea.hbm %s789_s30, 32 }
  0x39   : > { %p539_p5 = scmp.ne.s32.totalorder %s789_s30, %s538_s7  ;;  %p540_p7 = pneg %p793_p11 }
  0x3a   : > { %s543_s18 = scalar_lea.hbm %s899_s0, 64  ;;  %p544_p0 = scmp.lt.u32.totalorder %s789_s30, %s899_s0 }
  0x3b   : > { %p541_p10 = pnand %p540_p7, %p539_p5  ;;  %p545_p1 = scmp.lt.u32.totalorder %s543_s18, %s538_s7 }
  0x3c   : > { %p547_p4 = scmp.lt.u32.totalorder %s538_s7, %s789_s30 }
  0x3d   : > { %p542_p12 = pneg %p541_p10  ;;  %p546_p2 = por %p545_p1, %p544_p0 }
  0x3f   : > { %p548_p6 = por %p547_p4, %p546_p2 }
  0x41   : > { %p549_p8 = pnand %p548_p6, %p542_p12 }
  0x43   : > { %552 = shalt.err (!%p549_p8)
}
  0x44   : > { %s553_s19 = scalar_lea.vmem %s797_s4, 32  ;;  %s662_s28 = smov [#allocation2]  }
  0x45   : > { %p554_p9 = scmp.ne.s32.totalorder %s797_s4, %s553_s19  ;;  %s558_s29 = sshll.u32 %s662_s28, 4  ;;  %s559_s29 = int_to_ptr.vmem [resolvable:$false] %s558_s29 }
  0x46   : > { %s560_s21 = scalar_lea.vmem %s559_s29, 64  ;;  %p561_p10 = scmp.lt.s32.totalorder %s797_s4, %s559_s29 }
  0x47   : > { %p556_p3 = pnand %p554_p9, %p540_p7  ;;  %p562_p0 = scmp.lt.s32.totalorder %s560_s21, %s553_s19 }
  0x49   : > { %p557_p5 = pneg %p556_p3  ;;  %p563_p1 = por %p562_p0, %p561_p10 }
  0x4b   : > { %p564_p2 = pnand %p563_p1, %p557_p5 }
  0x4d   : > { %567 = shalt.err (!%p564_p2)
}
  0x4e   : > { %437 = dma.hbm_to_vmem [thread:$0]  (!%p793_p11), %s789_s30, 32, %s797_s4, %s172_s6  }
  0x4f   : > { %p916_p12 = scmp.ne.s32.totalorder %s911_s27, 0 }
  0x50   : > { %s827_s7 = sand.u32 (!%p916_p12), 1, %s642_s13   ;;  %p917_p7 = scmp.ne.s32.totalorder (!%p916_p12), %s909_s22, 0 }
  0x51   : > { %192 = sbr.rel (%p916_p12) target bundleno = 136 (0x88), region = 32  ;;  %s396_s8 = sshll.u32 (!%p916_p12), %s827_s7, 1 }
  0x52   : > { %s195_s10 = scalar_lea.sflag (!%p916_p12), [#allocation3], %s827_s7  ;;  %s198_s18 = scalar_lea.vmem (!%p916_p12), [#allocation2], %s396_s8 }
  0x58   : > { %621 = dma.done.wait (%p917_p7), %s195_s10, 32  }
  0x59   : > { %623 = vsyncadd (%p917_p7), %s195_s10, 4294967264  ;;  %p918_p4 = scmp.ne.s32.totalorder %s907_s20, 0 }
  0x5b   : > { %625 = dma.done.wait (%p918_p4), [#allocation5], 16  }
  0x5c   : > { %627 = vsyncadd (%p918_p4), [#allocation5], 4294967280 }
  0x5d   : > { %629 = dma.done.wait (%p918_p4), [#allocation8], 16  }
  0x5e   : > { %631 = vsyncadd (%p918_p4), [#allocation8], 4294967280 }
  0x5f   : > { %211 = sfence }
  0x60   : > { %s231_s27 = sld [smem:[#allocation6]]  ;;  %s400_s4 = sld [smem:[#allocation6 + $0x1]]  ;;  %v230_v0 = vld [vmem:[%s198_s18] sm:$0x3] }
  0x61   : > { %s234_s30 = sld [smem:[#allocation7]]  ;;  %s401_s5 = sld [smem:[#allocation7 + $0x1]] }
  0x62   : > { %s403_s22 = sld [smem:[#allocation6 + $0x2]]  ;;  %s406_s24 = sld [smem:[#allocation6 + $0x3]] }
  0x63   : > { %s404_s6 = sld [smem:[#allocation7 + $0x2]]  ;;  %s407_s25 = sld [smem:[#allocation7 + $0x3]] }
  0x64   : > { %s399_s20 = sshll.u32 %s827_s7, 3  ;;  %s414_s29 = sshll.u32 %s650_s15, 7 }
  0x65   : > { %s229_s19 = scalar_lea.vmem [#allocation9], %s399_s20  ;;  %s850_s10 = scalar_lea.hbm %s902_s3, %s414_s29 }
  0x66   : > { %v232_v1 = vstv %s231_s27  ;;  %v240_v4 = vstv %s400_s4  ;;  %s281_s28 = sshll.u32 %s229_s19, 4  ;;  %s267_s18 = scalar_lea.sflag [#allocation4], %s827_s7  ;;  %s845_s28 = int_to_ptr.vmem [resolvable:$true] %s281_s28 }
  0x67   : > { %v233_v2 = vmul.f32 %v232_v1, %v230_v0  ;;  %v235_v3 = vstv %s234_s30  ;;  %v241_v6 = vmul.f32 %v240_v4, %v230_v0  ;;  %v243_v7 = vstv %s401_s5  ;;  %s568_s27 = scalar_lea.vmem %s845_s28, 128  ;;  %s663_s15 = smov [#allocation9]  }
  0x68   : > { %v249_v8 = vstv %s403_s22  ;;  %v258_v12 = vstv %s406_s24  ;;  %p569_p11 = scmp.ne.s32.totalorder %s845_s28, %s568_s27  ;;  %s572_s30 = sshll.u32 %s663_s15, 4  ;;  %s573_s30 = int_to_ptr.vmem [resolvable:$false] %s572_s30 }
  0x69   : > { %v236_v5 = vadd.f32 %v235_v3, %v233_v2  ;;  %v252_v9 = vstv %s404_s6  ;;  %v244_v10 = vadd.f32 %v243_v7, %v241_v6  ;;  %v250_v11 = vmul.f32 %v249_v8, %v230_v0  ;;  %s574_s4 = scalar_lea.vmem %s573_s30, 256  ;;  %p575_p9 = scmp.lt.s32.totalorder %s845_s28, %s573_s30 }
  0x6a   : > { %v259_v13 = vmul.f32 %v258_v12, %v230_v0  ;;  %v261_v14 = vstv %s407_s25  ;;  %p570_p6 = pnand %p569_p11, %p775_p13  ;;  %p576_p3 = scmp.lt.s32.totalorder %s574_s4, %s568_s27 }
  0x6b   : > { %500 = vtanh.f32 %v236_v5  ;;  %v253_v15 = vadd.f32 %v252_v9, %v250_v11 }
  0x6c   : > { %502 = vtanh.f32 %v244_v10  ;;  %v262_v16 = vadd.f32 %v261_v14, %v259_v13  ;;  %p571_p8 = pneg %p570_p6  ;;  %p577_p5 = por %p576_p3, %p575_p9 }
  0x6d   : > { %504 = vtanh.f32 %v253_v15 }
  0x6e   : > { %506 = vtanh.f32 %v262_v16  ;;  %p578_p10 = pnand %p577_p5, %p571_p8 }
  0x75   : > { %v501_v17 = vpop.eup %500 }
  0x76   : > { %238 = vst [vmem:[%s229_s19] sm:$0x3] %v501_v17  ;;  %v503_v18 = vpop.eup %502 }
  0x77   : > { %402 = vst [vmem:[%s229_s19 + $0x2] sm:$0x3] %v503_v18  ;;  %v505_v19 = vpop.eup %504 }
  0x78   : > { %v507_v20 = vpop.eup %506  ;;  %405 = vst [vmem:[%s229_s19 + $0x4] sm:$0x3] %v505_v19 }
  0x79   : > { %408 = vst [vmem:[%s229_s19 + $0x6] sm:$0x3] %v507_v20 }
  0x7a   : > { %581 = shalt.err (!%p578_p10)
}
  0x7b   : > { %s582_s5 = scalar_lea.hbm %s850_s10, 128  ;;  %s586_s24 = scalar_lea.hbm %s902_s3, 256 }
  0x7c   : > { %p583_p0 = scmp.ne.s32.totalorder %s850_s10, %s582_s5  ;;  %p587_p12 = scmp.lt.u32.totalorder %s850_s10, %s902_s3 }
  0x7d   : > { %p588_p7 = scmp.lt.u32.totalorder %s586_s24, %s582_s5  ;;  %p590_p11 = scmp.lt.u32.totalorder %s582_s5, %s850_s10 }
  0x7e   : > { %p584_p1 = pnand %p583_p0, %p775_p13 }
  0x7f   : > { %p589_p4 = por %p588_p7, %p587_p12 }
  0x80   : > { %p585_p2 = pneg %p584_p1 }
  0x81   : > { %p591_p6 = por %p590_p11, %p589_p4 }
  0x83   : > { %p592_p8 = pnand %p591_p6, %p585_p2 }
  0x85   : > { %595 = shalt.err (!%p592_p8)
}
  0x86   : > { %s664_s19 = smov 32   ;;  %s665_s29 = smov 2  }
  0x87   : > { %425 = dma.vmem_to_hbm [thread:$0]  (%p775_p13), %s845_s28, 128, %s850_s10, %s267_s18, %s664_s19, %s664_s19, %s665_s29  }
  0x88 PF: > { %s296_s21 = sand.u32 1, %s638_s12   ;;  %p919_p9 = scmp.ne.s32.totalorder %s910_s23, 0 }
  0x89   : > { %p920_p3 = scmp.ge.s32.totalorder %s658_s17, 2  ;;  %s297_s8 = scalar_lea.sflag [#allocation4], %s296_s21 }
  0x8b   : > { %p439_p5 = pnand %p920_p3, %p919_p9 }
  0x8d   : > { %633 = dma.done.wait (!%p439_p5), %s297_s8, 128  }
  0x8e   : > { %635 = vsyncadd (!%p439_p5), %s297_s8, 4294967168  ;;  %s21_s17 = sadd.s32 1, %s658_s17   ;;  %s921_s12 = smov %s642_s13 }
  0x8f   : > { %p18_p10 = scmp.ge.s32.totalorder %s21_s17, 4   ;;  %s922_s13 = smov %s646_s14 }
  0x90   : > { %s923_s14 = smov %s784_s26  ;;  %s924_s15 = smov %s654_s16 }
  0x91   : > { %s925_s16 = smov %s927_s9  ;;  %20 = sbr.rel (!%p18_p10) target bundleno = 8 (0x8), region = 89 }
  0x98   :  { %302 = vsyncpa [#allocation3], 1 }
  0x99   :  { %304 = vsyncpa [#allocation3 + $0x1], 1 }
  0x9a   :  { %305 = vsyncpa [#allocation4], 1 }
  0x9b   :  { %307 = vsyncpa [#allocation4 + $0x1], 1 }
  0x9c   :  { %308 = vsyncpa [#allocation5], 1 }
  0x9d   :  { %310 = vsyncpa [#allocation5 + $0x1], 1 }
  0x9e   :  { %311 = vsyncpa [#allocation8], 1 }

</bundles_post_ra>
